<compile_context>
chip_gen: v5e
topology: v5e:2x2
jax: 0.10.0
libtpu: 0.0.40
codegen_flags: <defaults>
</compile_context>

<pallas_src>
import functools

import jax
import jax.numpy as jnp
from jax.experimental import pallas as pl
from jax.experimental.pallas import tpu as pltpu


def _round_up(x, m):
    return ((x + m - 1) // m) * m


# ----------------------------- Pallas kernel --------------------------------

def _make_fusion_kernel(ch_list, slot_offs, chunk, num_chunks):
    """Fused (concat -> conv1x1+BN+ReLU -> conv1x1+BN+ReLU) kernel.

    Refs (in order):
      x_refs[i] : (Ci, TP)        per-input pixel tile (channels x pixels)
      w1_ref    : (Cmid, S_pad)   conv1 weight, BN folded, slot-padded columns
      b1_ref    : (Cmid, 1)       conv1 bias (BN folded)
      w2_ref    : (Cout, Cmid)    conv2 weight (BN folded)
      b2_ref    : (Cout, 1)       conv2 bias (BN folded)
      o_ref     : (Cout, TP)
      xcat_ref  : (S_pad, chunk)  VMEM scratch holding the fused channel concat
    """
    n_in = len(ch_list)
    has_pad = any(c % 8 != 0 for c in ch_list)

    # TODO(synk): for degenerate tiny-channel configs (Cmid/Cout <= ~16) a VPU
    # broadcast-FMA path could replace the (heavily padded) MXU dots; not
    # implemented — the merged single dot per layer is already one pass stream.
    def kernel(*refs):
        x_refs = refs[:n_in]
        w1_ref, b1_ref, w2_ref, b2_ref, o_ref, xcat_ref = refs[n_in:]
        c_mid = w1_ref.shape[0]
        c_out = w2_ref.shape[0]

        # Channel slots are rounded up to 8 sublanes; zero the scratch once per
        # grid step so the padding rows contribute exactly 0 to the contraction
        # (matching W1's zero-padded columns).
        if has_pad:
            xcat_ref[...] = jnp.zeros_like(xcat_ref)

        w1 = w1_ref[...]
        w2 = w2_ref[...]
        # Hoisted lane-broadcast of the biases (once per grid step, not per chunk).
        b1 = jnp.broadcast_to(b1_ref[...], (c_mid, chunk))
        b2 = jnp.broadcast_to(b2_ref[...], (c_out, chunk))

        # Static sub-chunk loop over lane slices of the big DMA tile: keeps the
        # per-chunk intermediates (Cmid/Cout x chunk) small (vreg/spill control)
        # while the HBM DMA tile stays large and lane-dense.
        for c in range(num_chunks):
            c0 = c * chunk  # static, 128-aligned by construction
            # Fused channel concat: copy each input's lane chunk into its
            # 8-aligned channel slot of the VMEM scratch (cast to f32 in VMEM).
            for i in range(n_in):
                xcat_ref[pl.ds(slot_offs[i], ch_list[i]), :] = (
                    x_refs[i][:, pl.ds(c0, chunk)].astype(jnp.float32))
            xcat = xcat_ref[...]
            # Layer 1: single matmul (concat already fused) + bias + ReLU.
            h = jnp.dot(w1, xcat, preferred_element_type=jnp.float32)
            h = jnp.maximum(h + b1, 0.0)
            # Layer 2: matmul + bias + ReLU.
            y = jnp.dot(w2, h, preferred_element_type=jnp.float32)
            y = jnp.maximum(y + b2, 0.0)
            o_ref[:, pl.ds(c0, chunk)] = y.astype(o_ref.dtype)

    return kernel


# ----------------------------- Tiling policy ---------------------------------

def _tpu_vmem_bytes():
    try:
        info = pltpu.get_tpu_info()
        cap = getattr(info, "vmem_capacity_bytes", None)
        if cap:
            return int(cap)
    except Exception:
        pass
    return 64 << 20  # conservative (v7x-sized) fallback


def _tiling_params(P, N, S, Cout):
    """Generation-aware pixel tile, compute sub-chunk and scoped-VMEM limit."""
    phys = _tpu_vmem_bytes()
    if phys >= (100 << 20):              # v5e / v6e: 128 MiB physical VMEM
        budget, max_tile, vmem_limit = 64 << 20, 8192, 96 << 20
    else:                                # v7x: 64 MiB physical VMEM
        budget, max_tile, vmem_limit = 24 << 20, 4096, 48 << 20

    # Double-buffered input + output DMA slabs per pixel column (f32 worst
    # case); weights / compute scratch are negligible.
    bytes_per_col = 4 * (2 * S + 2 * Cout + 8)
    cap = max(128, budget // bytes_per_col)
    tile = int(min(max_tile, cap))
    if tile >= P:
        tile = P                          # single tile; full dim is always legal
    else:
        tile = max(128, (tile // 128) * 128)

    # Ensure enough grid steps for 2-TensorCore sharding / DMA-compute overlap,
    # without shredding small problems (floor of 1024 lanes).
    min_steps, floor = 8, 1024
    while tile > floor and N * pl.cdiv(P, tile) < min_steps:
        tile = max(floor, ((tile // 2) // 128) * 128)

    # Compute sub-chunk (lanes) bounding live vreg/VMEM working set per step.
    chunk = tile
    if tile > 512:
        for c in (512, 256, 128):
            if tile % c == 0:
                chunk = c
                break
    num_chunks = tile // chunk
    return tile, chunk, num_chunks, vmem_limit


# ----------------------------- pallas_call wrapper ---------------------------

def _run_fusion(x_list, w1_pad, b1, w2, b2, out_dtype, *,
                tile_p, chunk, num_chunks, slot_offs, vmem_limit):
    """x_list[i]: (N, Ci, P). Returns (N, Cout, P) in `out_dtype`."""
    n_in = len(x_list)
    N, _, P = x_list[0].shape
    c_out = w2.shape[0]
    s_pad = w1_pad.shape[1]
    ch_list = tuple(int(x.shape[1]) for x in x_list)

    grid = (N, pl.cdiv(P, tile_p))

    in_specs = []
    for x in x_list:
        ci = int(x.shape[1])
        in_specs.append(pl.BlockSpec((None, ci, tile_p), lambda n, p: (n, 0, p)))
    in_specs.append(pl.BlockSpec(w1_pad.shape, lambda n, p: (0, 0)))
    in_specs.append(pl.BlockSpec(b1.shape, lambda n, p: (0, 0)))
    in_specs.append(pl.BlockSpec(w2.shape, lambda n, p: (0, 0)))
    in_specs.append(pl.BlockSpec(b2.shape, lambda n, p: (0, 0)))
    # TODO(synk): consider pipeline_mode=pl.Buffered(3) on activation specs if
    # xprof shows exposed DMA on v7x's shorter per-step compute.

    kernel = _make_fusion_kernel(ch_list, slot_offs, chunk, num_chunks)

    return pl.pallas_call(
        kernel,
        out_shape=jax.ShapeDtypeStruct((N, c_out, P), out_dtype),
        grid_spec=pltpu.PrefetchScalarGridSpec(
            num_scalar_prefetch=0,
            grid=grid,
            in_specs=in_specs,
            out_specs=pl.BlockSpec((None, c_out, tile_p),
                                   lambda n, p: (n, 0, p)),
            scratch_shapes=[pltpu.VMEM((s_pad, chunk), jnp.float32)],
        ),
        compiler_params=pltpu.CompilerParams(
            dimension_semantics=("parallel", "parallel"),
            vmem_limit_bytes=vmem_limit,
        ),
    )(*x_list, w1_pad, b1, w2, b2)


# ------------------------- Module (parameter setup) -------------------------

def _fold_bn(conv_w, gamma, beta, mean, var, eps=1e-5):
    """Fold eval-mode BatchNorm into a 1x1 conv.

    conv_w: (Cout, Cin). Returns (w_eff (Cout, Cin), b_eff (Cout, 1)) for
    left-multiplication of (Cin, P) pixel columns.
    """
    inv_std = 1.0 / jnp.sqrt(var + eps)
    scale = gamma * inv_std                     # (Cout,)
    w_eff = conv_w * scale[:, None]             # (Cout, Cin)
    b_eff = (beta - mean * scale)[:, None]      # (Cout, 1)
    return w_eff.astype(jnp.float32), b_eff.astype(jnp.float32)


class PointCatFusion:
    """JAX/Pallas port of the PyTorch PointCatFusion module (eval-mode BN)."""
    # TODO(synk): training-mode BatchNorm (batch statistics) is not implemented;
    # BN is folded into the 1x1 convs as its eval-mode affine transform.

    def __init__(self, in_channel_list, out_channel, key):
        assert len(in_channel_list) >= 2
        self.in_channel_list = tuple(int(c) for c in in_channel_list)
        self.out_channel = int(out_channel)
        s = sum(self.in_channel_list)
        c_mid = max(s // 2, self.out_channel)
        self.s, self.c_mid = s, c_mid

        k1, k2, k3, k4 = jax.random.split(key, 4)
        # Layer 1: Conv2d(s, c_mid, 1) + BN(c_mid) + ReLU
        conv1_w = jax.random.normal(k1, (c_mid, s), jnp.float32) * 0.1
        gamma1 = 1.0 + 0.05 * jax.random.normal(k2, (c_mid,), jnp.float32)
        beta1 = jnp.linspace(-0.1, 0.1, c_mid, dtype=jnp.float32)
        mean1 = 0.01 * jnp.arange(c_mid, dtype=jnp.float32)
        var1 = 1.0 + 0.02 * jnp.arange(c_mid, dtype=jnp.float32)
        w1, self.b1 = _fold_bn(conv1_w, gamma1, beta1, mean1, var1)
        self.w1_full = w1                            # (c_mid, s) for reference

        # Slot-pad conv1's input-channel columns so each fused input lands at
        # an 8-aligned sublane offset of the in-kernel concat scratch.
        slot_offs, off = [], 0
        for ci in self.in_channel_list:
            slot_offs.append(off)
            off += _round_up(ci, 8)
        self.slot_offs = tuple(slot_offs)
        self.s_pad = off
        w1_pad = jnp.zeros((c_mid, self.s_pad), jnp.float32)
        coff = 0
        for ci, soff in zip(self.in_channel_list, self.slot_offs):
            w1_pad = w1_pad.at[:, soff:soff + ci].set(w1[:, coff:coff + ci])
            coff += ci
        self.w1_pad = w1_pad

        # Layer 2: Conv2d(c_mid, out_channel, 1) + BN(out_channel) + ReLU
        conv2_w = jax.random.normal(k3, (self.out_channel, c_mid),
                                    jnp.float32) * 0.1
        gamma2 = 1.0 + 0.05 * jax.random.normal(k4, (self.out_channel,),
                                                jnp.float32)
        beta2 = jnp.linspace(-0.05, 0.05, self.out_channel, dtype=jnp.float32)
        mean2 = 0.01 * jnp.arange(self.out_channel, dtype=jnp.float32)
        var2 = 1.0 + 0.03 * jnp.arange(self.out_channel, dtype=jnp.float32)
        self.w2, self.b2 = _fold_bn(conv2_w, gamma2, beta2, mean2, var2)

    @functools.partial(jax.jit, static_argnums=0)
    def __call__(self, *x_list):
        assert len(x_list) == len(self.in_channel_list)
        N, _, H, W = x_list[0].shape
        P = H * W
        # NCHW is contiguous -> (N, Ci, H*W) is a free reshape: no transpose,
        # no HBM concat, no wrapper-side dtype cast of the activations.
        x_flat = [x.reshape(x.shape[0], x.shape[1], P) for x in x_list]
        tile_p, chunk, num_chunks, vmem_limit = _tiling_params(
            P, N, self.s, self.out_channel)
        y = _run_fusion(x_flat, self.w1_pad, self.b1, self.w2, self.b2,
                        x_list[0].dtype,
                        tile_p=tile_p, chunk=chunk, num_chunks=num_chunks,
                        slot_offs=self.slot_offs, vmem_limit=vmem_limit)
        return y.reshape(N, self.out_channel, H, W)


# ----------------------------- Reference (JAX) -------------------------------

def _reference(module, *x_list):
    x = jnp.concatenate(x_list, axis=1)                 # (N, S, H, W)
    N, S, H, W = x.shape
    xf = x.reshape(N, S, H * W).astype(jnp.float32)
    h = jnp.maximum(
        jnp.einsum("ms,nsp->nmp", module.w1_full, xf) + module.b1[None], 0.0)
    y = jnp.maximum(
        jnp.einsum("om,nmp->nop", module.w2, h) + module.b2[None], 0.0)
    return y.reshape(N, module.out_channel, H, W)


# ---------------------------------- main -------------------------------------

if __name__ == "__main__":
    key = jax.random.PRNGKey(0)
    k_p, k_a, k_b = jax.random.split(key, 3)

    # Small shapes consistent with the module: two inputs of 4 channels each,
    # out_channel = 8  ->  s = 8, c_mid = max(4, 8) = 8.
    N, H, W = 2, 16, 16
    in_channel_list = [4, 4]
    out_channel = 8

    module = PointCatFusion(in_channel_list, out_channel, k_p)

    x1 = jax.random.normal(k_a, (N, in_channel_list[0], H, W), jnp.float32)
    x2 = jax.random.normal(k_b, (N, in_channel_list[1], H, W), jnp.float32)

    y = module(x1, x2)
    y = jax.block_until_ready(y)

    y_ref = _reference(module, x1, x2)
    assert y.shape == (N, out_channel, H, W)
    assert jnp.allclose(y, y_ref, atol=1e-5, rtol=1e-5), "mismatch vs reference"

    print("KERNEL_OK")
</pallas_src>

<mosaic_0001>
module attributes {stable_mosaic.version = 11 : i64} {
  func.func @kernel(%arg0: i32, %arg1: i32, %arg2: memref<1x4x256xf32, #tpu.memory_space<vmem>>, %arg3: memref<1x4x256xf32, #tpu.memory_space<vmem>>, %arg4: memref<8x16xf32, #tpu.memory_space<vmem>>, %arg5: memref<8x1xf32, #tpu.memory_space<vmem>>, %arg6: memref<8x8xf32, #tpu.memory_space<vmem>>, %arg7: memref<8x1xf32, #tpu.memory_space<vmem>>, %arg8: memref<1x8x256xf32, #tpu.memory_space<vmem>>, %arg9: memref<16x256xf32, #tpu.memory_space<vmem>>) attributes {dimension_semantics = [#tpu.dimension_semantics<parallel>, #tpu.dimension_semantics<parallel>], iteration_bounds = array<i64: 2, 1>, scalar_prefetch = 0 : i64, scratch_operands = 1 : i64, tpu.core_type = #tpu.core_type<tc>, window_params = [{transform_indices = @transform_0, window_bounds = array<i64: 1, 4, 256>}, {transform_indices = @transform_1, window_bounds = array<i64: 1, 4, 256>}, {pipeline_mode = #tpu.pipeline_mode<synchronous>, transform_indices = @transform_2, window_bounds = array<i64: 8, 16>}, {pipeline_mode = #tpu.pipeline_mode<synchronous>, transform_indices = @transform_3, window_bounds = array<i64: 8, 1>}, {pipeline_mode = #tpu.pipeline_mode<synchronous>, transform_indices = @transform_4, window_bounds = array<i64: 8, 8>}, {pipeline_mode = #tpu.pipeline_mode<synchronous>, transform_indices = @transform_5, window_bounds = array<i64: 8, 1>}, {transform_indices = @transform_6, window_bounds = array<i64: 1, 8, 256>}]} {
    %cst = arith.constant 0.000000e+00 : f32
    %0 = vector.broadcast %cst : f32 to vector<16x256xf32>
    %c0 = arith.constant 0 : index
    %c0_0 = arith.constant 0 : index
    %1 = vector.load %arg9[%c0, %c0_0] : memref<16x256xf32, #tpu.memory_space<vmem>>, vector<16x256xf32>
    tpu.vector_store %arg9[%c0, %c0_0], %0 {strides = array<i32>} : memref<16x256xf32, #tpu.memory_space<vmem>>, vector<16x256xf32>,
    %c0_1 = arith.constant 0 : index
    %c0_2 = arith.constant 0 : index
    %2 = vector.load %arg4[%c0_1, %c0_2] : memref<8x16xf32, #tpu.memory_space<vmem>>, vector<8x16xf32>
    %c0_3 = arith.constant 0 : index
    %c0_4 = arith.constant 0 : index
    %3 = vector.load %arg6[%c0_3, %c0_4] : memref<8x8xf32, #tpu.memory_space<vmem>>, vector<8x8xf32>
    %c0_5 = arith.constant 0 : index
    %c0_6 = arith.constant 0 : index
    %4 = vector.load %arg5[%c0_5, %c0_6] : memref<8x1xf32, #tpu.memory_space<vmem>>, vector<8x1xf32>
    %5 = vector.shape_cast %4 : vector<8x1xf32> to vector<8x1xf32>
    %6 = vector.broadcast %5 : vector<8x1xf32> to vector<8x256xf32>
    %c0_7 = arith.constant 0 : index
    %c0_8 = arith.constant 0 : index
    %7 = vector.load %arg7[%c0_7, %c0_8] : memref<8x1xf32, #tpu.memory_space<vmem>>, vector<8x1xf32>
    %8 = vector.shape_cast %7 : vector<8x1xf32> to vector<8x1xf32>
    %9 = vector.broadcast %8 : vector<8x1xf32> to vector<8x256xf32>
    %c0_9 = arith.constant 0 : index
    %c0_10 = arith.constant 0 : index
    %c0_11 = arith.constant 0 : index
    %10 = vector.load %arg2[%c0_9, %c0_10, %c0_11] : memref<1x4x256xf32, #tpu.memory_space<vmem>>, vector<1x4x256xf32>
    %11 = vector.shape_cast %10 : vector<1x4x256xf32> to vector<4x256xf32>
    %c0_12 = arith.constant 0 : index
    %c0_13 = arith.constant 0 : index
    %12 = vector.load %arg9[%c0_12, %c0_13] : memref<16x256xf32, #tpu.memory_space<vmem>>, vector<4x256xf32>
    tpu.vector_store %arg9[%c0_12, %c0_13], %11 {strides = array<i32>} : memref<16x256xf32, #tpu.memory_space<vmem>>, vector<4x256xf32>,
    %c0_14 = arith.constant 0 : index
    %c0_15 = arith.constant 0 : index
    %c0_16 = arith.constant 0 : index
    %13 = vector.load %arg3[%c0_14, %c0_15, %c0_16] : memref<1x4x256xf32, #tpu.memory_space<vmem>>, vector<1x4x256xf32>
    %14 = vector.shape_cast %13 : vector<1x4x256xf32> to vector<4x256xf32>
    %c8 = arith.constant 8 : index
    %c0_17 = arith.constant 0 : index
    %15 = vector.load %arg9[%c8, %c0_17] : memref<16x256xf32, #tpu.memory_space<vmem>>, vector<4x256xf32>
    tpu.vector_store %arg9[%c8, %c0_17], %14 {strides = array<i32>} : memref<16x256xf32, #tpu.memory_space<vmem>>, vector<4x256xf32>,
    %c0_18 = arith.constant 0 : index
    %c0_19 = arith.constant 0 : index
    %16 = vector.load %arg9[%c0_18, %c0_19] : memref<16x256xf32, #tpu.memory_space<vmem>>, vector<16x256xf32>
    %cst_20 = arith.constant dense<0.000000e+00> : vector<8x256xf32>
    %17 = tpu.matmul %2, %16, %cst_20 {dimension_numbers = #tpu.dot_dimension_numbers<[1], [0], [0], [1], [0, 0, 1, 1], [], []>} : vector<8x16xf32>, vector<16x256xf32>, vector<8x256xf32> -> vector<8x256xf32>
    %18 = arith.addf %17, %6 : vector<8x256xf32>
    %cst_21 = arith.constant 0.000000e+00 : f32
    %19 = vector.broadcast %cst_21 : f32 to vector<8x256xf32>
    %20 = arith.maximumf %18, %19 : vector<8x256xf32>
    %cst_22 = arith.constant dense<0.000000e+00> : vector<8x256xf32>
    %21 = tpu.matmul %3, %20, %cst_22 {dimension_numbers = #tpu.dot_dimension_numbers<[1], [0], [0], [1], [0, 0, 1, 1], [], []>} : vector<8x8xf32>, vector<8x256xf32>, vector<8x256xf32> -> vector<8x256xf32>
    %22 = arith.addf %21, %9 : vector<8x256xf32>
    %cst_23 = arith.constant 0.000000e+00 : f32
    %23 = vector.broadcast %cst_23 : f32 to vector<8x256xf32>
    %24 = arith.maximumf %22, %23 : vector<8x256xf32>
    %c0_24 = arith.constant 0 : index
    %c0_25 = arith.constant 0 : index
    %c0_26 = arith.constant 0 : index
    %25 = vector.load %arg8[%c0_24, %c0_25, %c0_26] : memref<1x8x256xf32, #tpu.memory_space<vmem>>, vector<1x8x256xf32>
    %26 = vector.shape_cast %25 : vector<1x8x256xf32> to vector<8x256xf32>
    %27 = vector.shape_cast %24 : vector<8x256xf32> to vector<1x8x256xf32>
    tpu.vector_store %arg8[%c0_24, %c0_25, %c0_26], %27 {strides = array<i32>} : memref<1x8x256xf32, #tpu.memory_space<vmem>>, vector<1x8x256xf32>,
    return
  }
  func.func @transform_0(%arg0: i32, %arg1: i32) -> (i32, i32, i32) {
    %c0_i32 = arith.constant 0 : i32
    %c0_i32_0 = arith.constant 0 : i32
    return %arg0, %c0_i32, %arg1 : i32, i32, i32
  }
  func.func @transform_1(%arg0: i32, %arg1: i32) -> (i32, i32, i32) {
    %c0_i32 = arith.constant 0 : i32
    %c0_i32_0 = arith.constant 0 : i32
    return %arg0, %c0_i32, %arg1 : i32, i32, i32
  }
  func.func @transform_2(%arg0: i32, %arg1: i32) -> (i32, i32) {
    %c0_i32 = arith.constant 0 : i32
    %c0_i32_0 = arith.constant 0 : i32
    %c0_i32_1 = arith.constant 0 : i32
    return %c0_i32, %c0_i32_0 : i32, i32
  }
  func.func @transform_3(%arg0: i32, %arg1: i32) -> (i32, i32) {
    %c0_i32 = arith.constant 0 : i32
    %c0_i32_0 = arith.constant 0 : i32
    %c0_i32_1 = arith.constant 0 : i32
    return %c0_i32, %c0_i32_0 : i32, i32
  }
  func.func @transform_4(%arg0: i32, %arg1: i32) -> (i32, i32) {
    %c0_i32 = arith.constant 0 : i32
    %c0_i32_0 = arith.constant 0 : i32
    %c0_i32_1 = arith.constant 0 : i32
    return %c0_i32, %c0_i32_0 : i32, i32
  }
  func.func @transform_5(%arg0: i32, %arg1: i32) -> (i32, i32) {
    %c0_i32 = arith.constant 0 : i32
    %c0_i32_0 = arith.constant 0 : i32
    %c0_i32_1 = arith.constant 0 : i32
    return %c0_i32, %c0_i32_0 : i32, i32
  }
  func.func @transform_6(%arg0: i32, %arg1: i32) -> (i32, i32, i32) {
    %c0_i32 = arith.constant 0 : i32
    %c0_i32_0 = arith.constant 0 : i32
    return %arg0, %c0_i32, %arg1 : i32, i32, i32
  }
}

</mosaic_0001>

<bundles_post_ra>
// kernel: a_call__.1
= control target key start
LH: loop header
LB: loop body
LE: loop exit
PB: predicated region body
PF: predicated region fallthrough
CT: control target
= control target key end

     0   :  { %s674_s21 = smov 0   ;;  %s676_s22 = smov 0   ;;  %s726_s0 = inlined_call_operand.vmem [shape: f32[2,4,256], index: 0, kind: input, shape index: {}]   ;;  %s727_s1 = inlined_call_operand.vmem [shape: f32[2,4,256], index: 1, kind: input, shape index: {}]   ;;  %s728_s2 = inlined_call_operand.vmem [shape: f32[8,16], index: 2, kind: input, shape index: {}]   ;;  %s729_s3 = inlined_call_operand.vmem [shape: f32[8,1], index: 3, kind: input, shape index: {}]   ;;  %s730_s4 = inlined_call_operand.vmem [shape: f32[8,8], index: 4, kind: input, shape index: {}]   ;;  %s731_s5 = inlined_call_operand.vmem [shape: f32[8,1], index: 5, kind: input, shape index: {}]   ;;  %s732_s6 = inlined_call_operand.vmem [shape: f32[2,8,256], index: 6, kind: output, shape index: {}]  }
   0x1   :  { %s678_s23 = smov 0  }
   0x2 LB: > { %s28_s24 = sadd.s32 1, %s631_s22  ;;  %p570_p0 = scmp.ge.s32.totalorder %s635_s23, 1  ;;  %s635_s23 = sphi %s678_s23, %s16_s23   ;;  %s631_s22 = sphi %s676_s22, %s734_s22   ;;  %s627_s21 = sphi %s674_s21, %s733_s21  }
   0x3   : > { %p30_p1 = scmp.ge.s32.totalorder %s28_s24, 2  ;;  %p250_p2 = scmp.lt.s32.totalorder %s635_s23, 3 }
   0x5   : > { %s736_s24 = smov (%p30_p1, %s28_s24), 0  ;;  %p251_p3 = pnand %p570_p0, %p250_p2 }
   0x6   : > { %p298_p4 = scmp.lt.s32.totalorder (!%p251_p3), %s627_s21, 1 }
   0x7   : > { %254 = sbr.rel (%p251_p3) target bundleno = 313 (0x139), region = 44 }
   0xc   : > { %v637_v0 = vmov 0.0   ;;  %s738_s21 = smov (!%p298_p4, %s627_s21), 1  ;;  %v333_v1 = vld [vmem:[%s729_s3] sm:$0xff]  ;;  %v638_v2 = vmov 0   ;;  %vm367_vm0 = vcmask 130048   ;;  %vm413_vm1 = vcmask 64512  }
   0xd   : > { %329 = vst [vmem:[#allocation2 + $0x18] sm:$0xff] %v637_v0  ;;  %s583_s27 = sshll.u32 %s738_s21, 3  ;;  %612 = vset.pattern.permute.xlu0 %v638_v2  ;;  %v339_v4 = vld [vmem:[%s731_s5] sm:$0xff]  ;;  %s585_s16 = sshll.u32 %s738_s21, 4 }
   0xe   : > { %327 = vst [vmem:[#allocation2 + $0x10] sm:$0xff] %v637_v0  ;;  %s305_s30 = scalar_lea.vmem %s726_s0, %s583_s27  ;;  %336 = vperm.xlu0 %612, %v333_v1   ;;  %s315_s9 = scalar_lea.vmem %s727_s1, %s583_s27  ;;  %v331_v14 = vld [vmem:[%s728_s2] sm:$0xff] }
   0xf   : > { %328 = vst [vmem:[#allocation2] sm:$0xff] %v637_v0  ;;  %v345_v3 = vld [vmem:[%s305_s30] sm:$0xff]  ;;  %s325_s19 = scalar_lea.vmem %s732_s6, %s585_s16 }
  0x10   : > { %330 = vst [vmem:[#allocation2 + $0x8] sm:$0xff] %v637_v0  ;;  %v354_v5 = vld [vmem:[%s315_s9] sm:$0xff] }
  0x11   : > { %347 = vst [vmem:[#allocation1] ss:$2 sm:$0xff] %v345_v3  ;;  %v332_v21 = vld [vmem:[%s730_s4] sm:$0xff] }
  0x16   : > { %342 = vperm.xlu0 %612, %v339_v4  }
  0x18   : > { %v348_v6 = vld.sshfl [vmem:[#allocation1] sm:$0xff pattern:$0x75316420]  ;;  %v349_v7 = vld.sshfl [vmem:[#allocation1 + $0x8] sm:$0xff pattern:$0x75316420] }
  0x19   : > { %356 = vst [vmem:[#allocation1] ss:$2 sm:$0xff] %v354_v5 }
  0x1a   : > { %352 = vst [vmem:[#allocation2 + $0x10] sm:$0xf] %v348_v6 }
  0x1b   : > { %353 = vst [vmem:[#allocation2] sm:$0xf] %v349_v7 }
  0x20   : > { %v357_v8 = vld.sshfl [vmem:[#allocation1] sm:$0xff pattern:$0x75316420]  ;;  %v358_v9 = vld.sshfl [vmem:[#allocation1 + $0x8] sm:$0xff pattern:$0x75316420] }
  0x21   : > { %361 = vst [vmem:[#allocation2 + $0x18] sm:$0xf] %v357_v8  ;;  %v363_v11 = vld [vmem:[#allocation2 + $0x10] sm:$0xff] }
  0x22   : > { %362 = vst [vmem:[#allocation2 + $0x8] sm:$0xf] %v358_v9  ;;  %v364_v13 = vld [vmem:[#allocation2] sm:$0xff] }
  0x28   : > { %v365_v10 = vld [vmem:[#allocation2 + $0x18] sm:$0xff] }
  0x29   : > { %385 = vmatpush.msra.mxu0 %v365_v10  ;;  %v366_v12 = vld [vmem:[#allocation2 + $0x8] sm:$0xff] }
  0x2a   : > { %405 = vmatpush.msra.mxu1 %v366_v12 }
  0x2b   : > { %386 = vmatpush.msra.mxu0 %v363_v11 }
  0x2c   : > { %406 = vmatpush.msra.mxu1 %v364_v13  ;;  %577 = vmatmul.msk.f32.vlgmr.msra.gmra.mxu0 %vm367_vm0, %v331_v14 }
  0x2d   : > { %578 = vmatmul.msk.f32.vlgmr.msra.gmra.mxu1 %vm367_vm0, %v331_v14 }
  0x80   : > { %v337_v15 = vpop.permute.xlu0 %336 }
  0x88   : > { %v343_v23 = vpop.permute.xlu0 %342 }
  0xa9   : > { %v388_v16 = vpop.f32.mrf.mxu0 }
  0xaa   : > { %v408_v17 = vpop.f32.mrf.mxu1  ;;  %v389_v18 = vadd.f32 %v388_v16, %v337_v15 }
  0xab   : > { %v409_v19 = vadd.f32 %v408_v17, %v337_v15 }
  0xac   : > { %v411_v20 = vmax.f32 %v389_v18, 0.0 }
  0xad   : > { %v412_v22 = vmax.f32 %v409_v19, 0.0 }
  0xae   : > { %432 = vmatpush.msra.mxu2 %v411_v20 }
  0xaf   : > { %452 = vmatpush.msra.mxu3 %v412_v22  ;;  %579 = vmatmul.msk.f32.vlgmr.msra.gmra.mxu2 %vm413_vm1, %v332_v21 }
  0xb0   : > { %580 = vmatmul.msk.f32.vlgmr.msra.gmra.mxu3 %vm413_vm1, %v332_v21 }
 0x132   : > { %v434_v24 = vpop.f32.mrf.mxu2 }
 0x133   : > { %v435_v25 = vadd.f32 %v434_v24, %v343_v23  ;;  %v454_v26 = vpop.f32.mrf.mxu3 }
 0x134   : > { %v455_v27 = vadd.f32 %v454_v26, %v343_v23 }
 0x135   : > { %v457_v28 = vmax.f32 %v435_v25, 0.0 }
 0x136   : > { %v458_v29 = vmax.f32 %v455_v27, 0.0 }
 0x137   : > { %459 = vst [vmem:[%s325_s19] sm:$0xff] %v457_v28 }
 0x138   : > { %460 = vst [vmem:[%s325_s19 + $0x8] sm:$0xff] %v458_v29 }
 0x139 PF: > { %s16_s23 = sadd.s32 1, %s635_s23   ;;  %s733_s21 = smov %s631_s22 }
 0x13a   : > { %p13_p5 = scmp.ge.s32.totalorder %s16_s23, 4   ;;  %s734_s22 = smov %s736_s24 }
 0x13c   :  { %15 = sbr.rel (!%p13_p5) target bundleno = 2 (0x2), region = 77 }

</bundles_post_ra>
